<compile_context>
chip_gen: v7x
topology: tpu7x:2x2x1
jax: 0.10.0
libtpu: 0.0.40
codegen_flags: <defaults>
</compile_context>

<pallas_src>
import jax
import jax.numpy as jnp
from jax import lax
from jax.experimental import pallas as pl
from jax.experimental.pallas import tpu as pltpu

_LANE = 128       # lane width: last dim of every BlockSpec must be a multiple of this
_CHUNK = 512      # in-kernel compute chunk (lanes): intermediates live in vregs
_MAX_TILE = 32768  # cap on per-grid-step DMA tile (lanes); ~1 MiB VMEM incl. double-buffering


def _round_up(x, m):
    return (x + m - 1) // m * m


def _choose_tiling(batch):
    """Return (n_blocks, b_tile, b_pad) for a batch of `batch` samples."""
    b_pad = _round_up(max(batch, 1), _LANE)
    if b_pad <= 2 * _CHUNK:
        return 1, b_pad, b_pad
    n_blocks = max(pl.cdiv(b_pad, _MAX_TILE), 2)     # >=2 steps: v7x 2-TC + pipelining
    b_tile = _round_up(pl.cdiv(b_pad, n_blocks), _CHUNK)
    return n_blocks, b_tile, n_blocks * b_tile


def _mlp_kernel(x_ref, w1_ref, b1_ref, w2_ref, b2_ref, w3t_ref, b3_ref, o_ref):
    bt = x_ref.shape[1]
    chunk = _CHUNK if bt % _CHUNK == 0 else bt        # bt is a multiple of 512 when > 1024
    n_chunks = bt // chunk

    # Tiny weights: read once per grid step, live in vregs for the whole tile.
    w1, b1 = w1_ref[...], b1_ref[...]                 # (16, 2), (16, 1)
    w2, b2 = w2_ref[...], b2_ref[...]                 # (8, 16), (8, 1)
    w3t, b3 = w3t_ref[...], b3_ref[...]               # (8, 2),  (2, 1)

    def dense_relu(w, b, h):
        # out[j,:] = relu(sum_k w[j,k] * h[k,:] + b[j]); K in {2,16}: unrolled VPU FMAs.
        n_out, k_in = w.shape
        acc = jnp.broadcast_to(b, (n_out, h.shape[1]))
        for k in range(k_in):
            acc = acc + w[:, k:k + 1] * h[k:k + 1, :]
        return jnp.maximum(acc, 0.0)

    def compute_chunk(start):
        x = x_ref[:, pl.ds(start, chunk)]             # (2,  chunk)
        h1 = dense_relu(w1, b1, x)                    # (16, chunk)
        h2 = dense_relu(w2, b2, h1)                   # (8,  chunk)
        # fc3: full-sublane multiplies + cross-sublane (XLU) reduce per output row.
        for j in range(2):
            row = jnp.sum(w3t[:, j:j + 1] * h2, axis=0, keepdims=True) + b3[j:j + 1, :]
            o_ref[j:j + 1, pl.ds(start, chunk)] = row.astype(o_ref.dtype)

    if n_chunks == 1:
        compute_chunk(0)
    else:
        def body(c, carry):
            compute_chunk(pl.multiple_of(c * chunk, chunk))
            return carry
        lax.fori_loop(0, n_chunks, body, 0, unroll=2)


def _resident(shape):
    # Constant block index across the batch grid -> fetched once, kept VMEM-resident.
    return pl.BlockSpec(shape, lambda i: (0,) * len(shape))


@jax.jit
def simple_nn_forward_fm(x_fm, params):
    """Feature-major forward: x_fm is (2, B) float32 -> (2, B).

    Preferred entry point: keeping activations feature-major end-to-end avoids the
    strided (B,2)<->(2,B) HBM relayouts entirely.
    """
    w1, b1 = params["w1"], params["b1"]
    w2, b2 = params["w2"], params["b2"]
    w3, b3 = params["w3"], params["b3"]
    w3t = w3.T                                        # (8, 2): lets fc3 use full sublanes

    batch = x_fm.shape[1]
    n_blocks, b_tile, b_pad = _choose_tiling(batch)
    x_p = jnp.pad(x_fm, ((0, 0), (0, b_pad - batch)))  # pad to <=127 extra lanes per block

    out = pl.pallas_call(
        _mlp_kernel,
        out_shape=jax.ShapeDtypeStruct((2, b_pad), jnp.float32),
        grid=(n_blocks,),
        in_specs=[
            pl.BlockSpec((2, b_tile), lambda i: (0, i)),   # batch tiled on lanes
            _resident(w1.shape), _resident(b1.shape),
            _resident(w2.shape), _resident(b2.shape),
            _resident(w3t.shape), _resident(b3.shape),
        ],
        out_specs=pl.BlockSpec((2, b_tile), lambda i: (0, i)),
        compiler_params=pltpu.CompilerParams(
            dimension_semantics=("parallel",),             # v7x: batch blocks over both TCs
        ),
    )(x_p, w1, b1, w2, b2, w3t, b3)

    return out[:, :batch]


@jax.jit
def simple_nn_forward(x, params):
    """PyTorch-layout forward: x is (B, 2) float32 -> (B, 2)."""
    return simple_nn_forward_fm(x.T, params).T


def _reference(x, p):
    dot = lambda a, b: jnp.dot(a, b, precision=jax.lax.Precision.HIGHEST)
    h1 = jnp.maximum(dot(x, p["w1"].T) + p["b1"].T, 0.0)
    h2 = jnp.maximum(dot(h1, p["w2"].T) + p["b2"].T, 0.0)
    return dot(h2, p["w3"].T) + p["b3"].T


def simple_nn(x, params):
    """Convenience dispatcher: tiny batches are cheaper as a plain fused XLA chain."""
    if x.shape[0] < 512:
        return _reference(x, params)
    return simple_nn_forward(x, params)


def init_params(key):
    """Deterministic init mimicking nn.Linear: W is (out, in), bias stored (out, 1)."""
    ks = jax.random.split(key, 6)

    def linear(kw, kb, fan_in, fan_out):
        bound = 1.0 / float(fan_in) ** 0.5
        w = jax.random.uniform(kw, (fan_out, fan_in), jnp.float32, -bound, bound)
        b = jax.random.uniform(kb, (fan_out, 1), jnp.float32, -bound, bound)
        return w, b

    w1, b1 = linear(ks[0], ks[1], 2, 16)
    w2, b2 = linear(ks[2], ks[3], 16, 8)
    w3, b3 = linear(ks[4], ks[5], 8, 2)
    return dict(w1=w1, b1=b1, w2=w2, b2=b2, w3=w3, b3=b3)


if __name__ == "__main__":
    key = jax.random.PRNGKey(0)
    k_x, k_x2, k_p = jax.random.split(key, 3)
    params = init_params(k_p)

    # Small batch consistent with the module (inference on a few samples).
    B = 8
    x = jax.random.normal(k_x, (B, 2), jnp.float32)
    out = jax.block_until_ready(simple_nn_forward(x, params))
    ref = _reference(x, params)
    assert out.shape == (B, 2)
    assert jnp.allclose(out, ref, atol=1e-5, rtol=1e-5)

    # Tiny-batch dispatcher (XLA fast path) agrees too.
    out_auto = simple_nn(x, params)
    assert jnp.allclose(out_auto, ref, atol=1e-5, rtol=1e-5)

    # Feature-major (relayout-free) path on a larger, non-tile-multiple batch:
    # exercises pad-to-128, the 2-step grid and the in-kernel chunk loop.
    B2 = 3000
    x2 = jax.random.normal(k_x2, (B2, 2), jnp.float32)
    out2 = jax.block_until_ready(simple_nn_forward_fm(x2.T, params))
    assert out2.shape == (2, B2)
    assert jnp.allclose(out2.T, _reference(x2, params), atol=1e-5, rtol=1e-5)

    print("KERNEL_OK")
</pallas_src>

<mosaic_0001>
module attributes {stable_mosaic.version = 11 : i64} {
  func.func @_mlp_kernel(%arg0: i32, %arg1: memref<2x128xf32, #tpu.memory_space<vmem>>, %arg2: memref<16x2xf32, #tpu.memory_space<vmem>>, %arg3: memref<16x1xf32, #tpu.memory_space<vmem>>, %arg4: memref<8x16xf32, #tpu.memory_space<vmem>>, %arg5: memref<8x1xf32, #tpu.memory_space<vmem>>, %arg6: memref<8x2xf32, #tpu.memory_space<vmem>>, %arg7: memref<2x1xf32, #tpu.memory_space<vmem>>, %arg8: memref<2x128xf32, #tpu.memory_space<vmem>>) attributes {dimension_semantics = [#tpu.dimension_semantics<parallel>], iteration_bounds = array<i64: 1>, scalar_prefetch = 0 : i64, scratch_operands = 0 : i64, tpu.core_type = #tpu.core_type<tc>, window_params = [{transform_indices = @transform_0, window_bounds = array<i64: 2, 128>}, {pipeline_mode = #tpu.pipeline_mode<synchronous>, transform_indices = @transform_1, window_bounds = array<i64: 16, 2>}, {pipeline_mode = #tpu.pipeline_mode<synchronous>, transform_indices = @transform_2, window_bounds = array<i64: 16, 1>}, {pipeline_mode = #tpu.pipeline_mode<synchronous>, transform_indices = @transform_3, window_bounds = array<i64: 8, 16>}, {pipeline_mode = #tpu.pipeline_mode<synchronous>, transform_indices = @transform_4, window_bounds = array<i64: 8, 1>}, {pipeline_mode = #tpu.pipeline_mode<synchronous>, transform_indices = @transform_5, window_bounds = array<i64: 8, 2>}, {pipeline_mode = #tpu.pipeline_mode<synchronous>, transform_indices = @transform_6, window_bounds = array<i64: 2, 1>}, {transform_indices = @transform_7, window_bounds = array<i64: 2, 128>}]} {
    %c0 = arith.constant 0 : index
    %c0_0 = arith.constant 0 : index
    %0 = vector.load %arg2[%c0, %c0_0] : memref<16x2xf32, #tpu.memory_space<vmem>>, vector<16x2xf32>
    %c0_1 = arith.constant 0 : index
    %c0_2 = arith.constant 0 : index
    %1 = vector.load %arg3[%c0_1, %c0_2] : memref<16x1xf32, #tpu.memory_space<vmem>>, vector<16x1xf32>
    %c0_3 = arith.constant 0 : index
    %c0_4 = arith.constant 0 : index
    %2 = vector.load %arg4[%c0_3, %c0_4] : memref<8x16xf32, #tpu.memory_space<vmem>>, vector<8x16xf32>
    %c0_5 = arith.constant 0 : index
    %c0_6 = arith.constant 0 : index
    %3 = vector.load %arg5[%c0_5, %c0_6] : memref<8x1xf32, #tpu.memory_space<vmem>>, vector<8x1xf32>
    %c0_7 = arith.constant 0 : index
    %c0_8 = arith.constant 0 : index
    %4 = vector.load %arg6[%c0_7, %c0_8] : memref<8x2xf32, #tpu.memory_space<vmem>>, vector<8x2xf32>
    %c0_9 = arith.constant 0 : index
    %c0_10 = arith.constant 0 : index
    %5 = vector.load %arg7[%c0_9, %c0_10] : memref<2x1xf32, #tpu.memory_space<vmem>>, vector<2x1xf32>
    %c0_11 = arith.constant 0 : index
    %c0_12 = arith.constant 0 : index
    %6 = vector.load %arg1[%c0_11, %c0_12] : memref<2x128xf32, #tpu.memory_space<vmem>>, vector<2x128xf32>
    %7 = vector.shape_cast %1 : vector<16x1xf32> to vector<16x1xf32>
    %8 = vector.broadcast %7 : vector<16x1xf32> to vector<16x128xf32>
    %9 = vector.extract_strided_slice %0 {offsets = [0, 0], sizes = [16, 1], strides = [1, 1]} : vector<16x2xf32> to vector<16x1xf32>
    %10 = vector.extract_strided_slice %6 {offsets = [0, 0], sizes = [1, 128], strides = [1, 1]} : vector<2x128xf32> to vector<1x128xf32>
    %11 = vector.broadcast %9 : vector<16x1xf32> to vector<16x128xf32>
    %12 = vector.broadcast %10 : vector<1x128xf32> to vector<16x128xf32>
    %13 = arith.mulf %11, %12 : vector<16x128xf32>
    %14 = arith.addf %8, %13 : vector<16x128xf32>
    %15 = vector.extract_strided_slice %0 {offsets = [0, 1], sizes = [16, 1], strides = [1, 1]} : vector<16x2xf32> to vector<16x1xf32>
    %16 = vector.extract_strided_slice %6 {offsets = [1, 0], sizes = [1, 128], strides = [1, 1]} : vector<2x128xf32> to vector<1x128xf32>
    %17 = vector.broadcast %15 : vector<16x1xf32> to vector<16x128xf32>
    %18 = vector.broadcast %16 : vector<1x128xf32> to vector<16x128xf32>
    %19 = arith.mulf %17, %18 : vector<16x128xf32>
    %20 = arith.addf %14, %19 : vector<16x128xf32>
    %cst = arith.constant 0.000000e+00 : f32
    %21 = vector.broadcast %cst : f32 to vector<16x128xf32>
    %22 = arith.maximumf %20, %21 : vector<16x128xf32>
    %23 = vector.shape_cast %3 : vector<8x1xf32> to vector<8x1xf32>
    %24 = vector.broadcast %23 : vector<8x1xf32> to vector<8x128xf32>
    %25 = vector.extract_strided_slice %2 {offsets = [0, 0], sizes = [8, 1], strides = [1, 1]} : vector<8x16xf32> to vector<8x1xf32>
    %26 = vector.extract_strided_slice %22 {offsets = [0, 0], sizes = [1, 128], strides = [1, 1]} : vector<16x128xf32> to vector<1x128xf32>
    %27 = vector.broadcast %25 : vector<8x1xf32> to vector<8x128xf32>
    %28 = vector.broadcast %26 : vector<1x128xf32> to vector<8x128xf32>
    %29 = arith.mulf %27, %28 : vector<8x128xf32>
    %30 = arith.addf %24, %29 : vector<8x128xf32>
    %31 = vector.extract_strided_slice %2 {offsets = [0, 1], sizes = [8, 1], strides = [1, 1]} : vector<8x16xf32> to vector<8x1xf32>
    %32 = vector.extract_strided_slice %22 {offsets = [1, 0], sizes = [1, 128], strides = [1, 1]} : vector<16x128xf32> to vector<1x128xf32>
    %33 = vector.broadcast %31 : vector<8x1xf32> to vector<8x128xf32>
    %34 = vector.broadcast %32 : vector<1x128xf32> to vector<8x128xf32>
    %35 = arith.mulf %33, %34 : vector<8x128xf32>
    %36 = arith.addf %30, %35 : vector<8x128xf32>
    %37 = vector.extract_strided_slice %2 {offsets = [0, 2], sizes = [8, 1], strides = [1, 1]} : vector<8x16xf32> to vector<8x1xf32>
    %38 = vector.extract_strided_slice %22 {offsets = [2, 0], sizes = [1, 128], strides = [1, 1]} : vector<16x128xf32> to vector<1x128xf32>
    %39 = vector.broadcast %37 : vector<8x1xf32> to vector<8x128xf32>
    %40 = vector.broadcast %38 : vector<1x128xf32> to vector<8x128xf32>
    %41 = arith.mulf %39, %40 : vector<8x128xf32>
    %42 = arith.addf %36, %41 : vector<8x128xf32>
    %43 = vector.extract_strided_slice %2 {offsets = [0, 3], sizes = [8, 1], strides = [1, 1]} : vector<8x16xf32> to vector<8x1xf32>
    %44 = vector.extract_strided_slice %22 {offsets = [3, 0], sizes = [1, 128], strides = [1, 1]} : vector<16x128xf32> to vector<1x128xf32>
    %45 = vector.broadcast %43 : vector<8x1xf32> to vector<8x128xf32>
    %46 = vector.broadcast %44 : vector<1x128xf32> to vector<8x128xf32>
    %47 = arith.mulf %45, %46 : vector<8x128xf32>
    %48 = arith.addf %42, %47 : vector<8x128xf32>
    %49 = vector.extract_strided_slice %2 {offsets = [0, 4], sizes = [8, 1], strides = [1, 1]} : vector<8x16xf32> to vector<8x1xf32>
    %50 = vector.extract_strided_slice %22 {offsets = [4, 0], sizes = [1, 128], strides = [1, 1]} : vector<16x128xf32> to vector<1x128xf32>
    %51 = vector.broadcast %49 : vector<8x1xf32> to vector<8x128xf32>
    %52 = vector.broadcast %50 : vector<1x128xf32> to vector<8x128xf32>
    %53 = arith.mulf %51, %52 : vector<8x128xf32>
    %54 = arith.addf %48, %53 : vector<8x128xf32>
    %55 = vector.extract_strided_slice %2 {offsets = [0, 5], sizes = [8, 1], strides = [1, 1]} : vector<8x16xf32> to vector<8x1xf32>
    %56 = vector.extract_strided_slice %22 {offsets = [5, 0], sizes = [1, 128], strides = [1, 1]} : vector<16x128xf32> to vector<1x128xf32>
    %57 = vector.broadcast %55 : vector<8x1xf32> to vector<8x128xf32>
    %58 = vector.broadcast %56 : vector<1x128xf32> to vector<8x128xf32>
    %59 = arith.mulf %57, %58 : vector<8x128xf32>
    %60 = arith.addf %54, %59 : vector<8x128xf32>
    %61 = vector.extract_strided_slice %2 {offsets = [0, 6], sizes = [8, 1], strides = [1, 1]} : vector<8x16xf32> to vector<8x1xf32>
    %62 = vector.extract_strided_slice %22 {offsets = [6, 0], sizes = [1, 128], strides = [1, 1]} : vector<16x128xf32> to vector<1x128xf32>
    %63 = vector.broadcast %61 : vector<8x1xf32> to vector<8x128xf32>
    %64 = vector.broadcast %62 : vector<1x128xf32> to vector<8x128xf32>
    %65 = arith.mulf %63, %64 : vector<8x128xf32>
    %66 = arith.addf %60, %65 : vector<8x128xf32>
    %67 = vector.extract_strided_slice %2 {offsets = [0, 7], sizes = [8, 1], strides = [1, 1]} : vector<8x16xf32> to vector<8x1xf32>
    %68 = vector.extract_strided_slice %22 {offsets = [7, 0], sizes = [1, 128], strides = [1, 1]} : vector<16x128xf32> to vector<1x128xf32>
    %69 = vector.broadcast %67 : vector<8x1xf32> to vector<8x128xf32>
    %70 = vector.broadcast %68 : vector<1x128xf32> to vector<8x128xf32>
    %71 = arith.mulf %69, %70 : vector<8x128xf32>
    %72 = arith.addf %66, %71 : vector<8x128xf32>
    %73 = vector.extract_strided_slice %2 {offsets = [0, 8], sizes = [8, 1], strides = [1, 1]} : vector<8x16xf32> to vector<8x1xf32>
    %74 = vector.extract_strided_slice %22 {offsets = [8, 0], sizes = [1, 128], strides = [1, 1]} : vector<16x128xf32> to vector<1x128xf32>
    %75 = vector.broadcast %73 : vector<8x1xf32> to vector<8x128xf32>
    %76 = vector.broadcast %74 : vector<1x128xf32> to vector<8x128xf32>
    %77 = arith.mulf %75, %76 : vector<8x128xf32>
    %78 = arith.addf %72, %77 : vector<8x128xf32>
    %79 = vector.extract_strided_slice %2 {offsets = [0, 9], sizes = [8, 1], strides = [1, 1]} : vector<8x16xf32> to vector<8x1xf32>
    %80 = vector.extract_strided_slice %22 {offsets = [9, 0], sizes = [1, 128], strides = [1, 1]} : vector<16x128xf32> to vector<1x128xf32>
    %81 = vector.broadcast %79 : vector<8x1xf32> to vector<8x128xf32>
    %82 = vector.broadcast %80 : vector<1x128xf32> to vector<8x128xf32>
    %83 = arith.mulf %81, %82 : vector<8x128xf32>
    %84 = arith.addf %78, %83 : vector<8x128xf32>
    %85 = vector.extract_strided_slice %2 {offsets = [0, 10], sizes = [8, 1], strides = [1, 1]} : vector<8x16xf32> to vector<8x1xf32>
    %86 = vector.extract_strided_slice %22 {offsets = [10, 0], sizes = [1, 128], strides = [1, 1]} : vector<16x128xf32> to vector<1x128xf32>
    %87 = vector.broadcast %85 : vector<8x1xf32> to vector<8x128xf32>
    %88 = vector.broadcast %86 : vector<1x128xf32> to vector<8x128xf32>
    %89 = arith.mulf %87, %88 : vector<8x128xf32>
    %90 = arith.addf %84, %89 : vector<8x128xf32>
    %91 = vector.extract_strided_slice %2 {offsets = [0, 11], sizes = [8, 1], strides = [1, 1]} : vector<8x16xf32> to vector<8x1xf32>
    %92 = vector.extract_strided_slice %22 {offsets = [11, 0], sizes = [1, 128], strides = [1, 1]} : vector<16x128xf32> to vector<1x128xf32>
    %93 = vector.broadcast %91 : vector<8x1xf32> to vector<8x128xf32>
    %94 = vector.broadcast %92 : vector<1x128xf32> to vector<8x128xf32>
    %95 = arith.mulf %93, %94 : vector<8x128xf32>
    %96 = arith.addf %90, %95 : vector<8x128xf32>
    %97 = vector.extract_strided_slice %2 {offsets = [0, 12], sizes = [8, 1], strides = [1, 1]} : vector<8x16xf32> to vector<8x1xf32>
    %98 = vector.extract_strided_slice %22 {offsets = [12, 0], sizes = [1, 128], strides = [1, 1]} : vector<16x128xf32> to vector<1x128xf32>
    %99 = vector.broadcast %97 : vector<8x1xf32> to vector<8x128xf32>
    %100 = vector.broadcast %98 : vector<1x128xf32> to vector<8x128xf32>
    %101 = arith.mulf %99, %100 : vector<8x128xf32>
    %102 = arith.addf %96, %101 : vector<8x128xf32>
    %103 = vector.extract_strided_slice %2 {offsets = [0, 13], sizes = [8, 1], strides = [1, 1]} : vector<8x16xf32> to vector<8x1xf32>
    %104 = vector.extract_strided_slice %22 {offsets = [13, 0], sizes = [1, 128], strides = [1, 1]} : vector<16x128xf32> to vector<1x128xf32>
    %105 = vector.broadcast %103 : vector<8x1xf32> to vector<8x128xf32>
    %106 = vector.broadcast %104 : vector<1x128xf32> to vector<8x128xf32>
    %107 = arith.mulf %105, %106 : vector<8x128xf32>
    %108 = arith.addf %102, %107 : vector<8x128xf32>
    %109 = vector.extract_strided_slice %2 {offsets = [0, 14], sizes = [8, 1], strides = [1, 1]} : vector<8x16xf32> to vector<8x1xf32>
    %110 = vector.extract_strided_slice %22 {offsets = [14, 0], sizes = [1, 128], strides = [1, 1]} : vector<16x128xf32> to vector<1x128xf32>
    %111 = vector.broadcast %109 : vector<8x1xf32> to vector<8x128xf32>
    %112 = vector.broadcast %110 : vector<1x128xf32> to vector<8x128xf32>
    %113 = arith.mulf %111, %112 : vector<8x128xf32>
    %114 = arith.addf %108, %113 : vector<8x128xf32>
    %115 = vector.extract_strided_slice %2 {offsets = [0, 15], sizes = [8, 1], strides = [1, 1]} : vector<8x16xf32> to vector<8x1xf32>
    %116 = vector.extract_strided_slice %22 {offsets = [15, 0], sizes = [1, 128], strides = [1, 1]} : vector<16x128xf32> to vector<1x128xf32>
    %117 = vector.broadcast %115 : vector<8x1xf32> to vector<8x128xf32>
    %118 = vector.broadcast %116 : vector<1x128xf32> to vector<8x128xf32>
    %119 = arith.mulf %117, %118 : vector<8x128xf32>
    %120 = arith.addf %114, %119 : vector<8x128xf32>
    %cst_13 = arith.constant 0.000000e+00 : f32
    %121 = vector.broadcast %cst_13 : f32 to vector<8x128xf32>
    %122 = arith.maximumf %120, %121 : vector<8x128xf32>
    %123 = vector.extract_strided_slice %4 {offsets = [0, 0], sizes = [8, 1], strides = [1, 1]} : vector<8x2xf32> to vector<8x1xf32>
    %124 = vector.broadcast %123 : vector<8x1xf32> to vector<8x128xf32>
    %125 = arith.mulf %124, %122 : vector<8x128xf32>
    %cst_14 = arith.constant dense<0.000000e+00> : vector<128xf32>
    %126 = vector.multi_reduction <add>, %125, %cst_14 [0] : vector<8x128xf32> to vector<128xf32>
    %127 = vector.shape_cast %126 : vector<128xf32> to vector<1x128xf32>
    %128 = vector.extract_strided_slice %5 {offsets = [0, 0], sizes = [1, 1], strides = [1, 1]} : vector<2x1xf32> to vector<1x1xf32>
    %129 = vector.broadcast %128 : vector<1x1xf32> to vector<1x128xf32>
    %130 = arith.addf %127, %129 : vector<1x128xf32>
    %c0_15 = arith.constant 0 : index
    %c0_16 = arith.constant 0 : index
    %131 = vector.load %arg8[%c0_15, %c0_16] : memref<2x128xf32, #tpu.memory_space<vmem>>, vector<1x128xf32>
    tpu.vector_store %arg8[%c0_15, %c0_16], %130 {strides = array<i32>} : memref<2x128xf32, #tpu.memory_space<vmem>>, vector<1x128xf32>,
    %132 = vector.extract_strided_slice %4 {offsets = [0, 1], sizes = [8, 1], strides = [1, 1]} : vector<8x2xf32> to vector<8x1xf32>
    %133 = vector.broadcast %132 : vector<8x1xf32> to vector<8x128xf32>
    %134 = arith.mulf %133, %122 : vector<8x128xf32>
    %cst_17 = arith.constant dense<0.000000e+00> : vector<128xf32>
    %135 = vector.multi_reduction <add>, %134, %cst_17 [0] : vector<8x128xf32> to vector<128xf32>
    %136 = vector.shape_cast %135 : vector<128xf32> to vector<1x128xf32>
    %137 = vector.extract_strided_slice %5 {offsets = [1, 0], sizes = [1, 1], strides = [1, 1]} : vector<2x1xf32> to vector<1x1xf32>
    %138 = vector.broadcast %137 : vector<1x1xf32> to vector<1x128xf32>
    %139 = arith.addf %136, %138 : vector<1x128xf32>
    %c1 = arith.constant 1 : index
    %c0_18 = arith.constant 0 : index
    %140 = vector.load %arg8[%c1, %c0_18] : memref<2x128xf32, #tpu.memory_space<vmem>>, vector<1x128xf32>
    tpu.vector_store %arg8[%c1, %c0_18], %139 {strides = array<i32>} : memref<2x128xf32, #tpu.memory_space<vmem>>, vector<1x128xf32>,
    return
  }
  func.func @transform_0(%arg0: i32) -> (i32, i32) {
    %c0_i32 = arith.constant 0 : i32
    %c0_i32_0 = arith.constant 0 : i32
    return %c0_i32, %arg0 : i32, i32
  }
  func.func @transform_1(%arg0: i32) -> (i32, i32) {
    %c0_i32 = arith.constant 0 : i32
    %c0_i32_0 = arith.constant 0 : i32
    %c0_i32_1 = arith.constant 0 : i32
    return %c0_i32, %c0_i32_0 : i32, i32
  }
  func.func @transform_2(%arg0: i32) -> (i32, i32) {
    %c0_i32 = arith.constant 0 : i32
    %c0_i32_0 = arith.constant 0 : i32
    %c0_i32_1 = arith.constant 0 : i32
    return %c0_i32, %c0_i32_0 : i32, i32
  }
  func.func @transform_3(%arg0: i32) -> (i32, i32) {
    %c0_i32 = arith.constant 0 : i32
    %c0_i32_0 = arith.constant 0 : i32
    %c0_i32_1 = arith.constant 0 : i32
    return %c0_i32, %c0_i32_0 : i32, i32
  }
  func.func @transform_4(%arg0: i32) -> (i32, i32) {
    %c0_i32 = arith.constant 0 : i32
    %c0_i32_0 = arith.constant 0 : i32
    %c0_i32_1 = arith.constant 0 : i32
    return %c0_i32, %c0_i32_0 : i32, i32
  }
  func.func @transform_5(%arg0: i32) -> (i32, i32) {
    %c0_i32 = arith.constant 0 : i32
    %c0_i32_0 = arith.constant 0 : i32
    %c0_i32_1 = arith.constant 0 : i32
    return %c0_i32, %c0_i32_0 : i32, i32
  }
  func.func @transform_6(%arg0: i32) -> (i32, i32) {
    %c0_i32 = arith.constant 0 : i32
    %c0_i32_0 = arith.constant 0 : i32
    %c0_i32_1 = arith.constant 0 : i32
    return %c0_i32, %c0_i32_0 : i32, i32
  }
  func.func @transform_7(%arg0: i32) -> (i32, i32) {
    %c0_i32 = arith.constant 0 : i32
    %c0_i32_0 = arith.constant 0 : i32
    return %c0_i32, %arg0 : i32, i32
  }
}

</mosaic_0001>

<bundles_post_ra>
// kernel: simple_nn_forward_fm.1
= control target key start
LH: loop header
LB: loop body
LE: loop exit
PB: predicated region body
PF: predicated region fallthrough
CT: control target
= control target key end

     0   :  { %v358_v2 = vmov 2   ;;  %v359_v3 = vmov 1   ;;  %s492_s0 = inlined_call_operand.vmem [shape: f32[2,128], index: 0, kind: input, shape index: {}]   ;;  %s493_s1 = inlined_call_operand.vmem [shape: f32[16,2], index: 1, kind: input, shape index: {}]   ;;  %s494_s2 = inlined_call_operand.vmem [shape: f32[16,1], index: 2, kind: input, shape index: {}]   ;;  %s495_s3 = inlined_call_operand.vmem [shape: f32[8,16], index: 3, kind: input, shape index: {}]   ;;  %s496_s4 = inlined_call_operand.vmem [shape: f32[8,1], index: 4, kind: input, shape index: {}]   ;;  %s497_s5 = inlined_call_operand.vmem [shape: f32[8,2], index: 5, kind: input, shape index: {}]   ;;  %s498_s6 = inlined_call_operand.vmem [shape: f32[2,1], index: 6, kind: input, shape index: {}]   ;;  %s499_s7 = inlined_call_operand.hbm [shape: f32[2,128], index: 7, kind: output, shape index: {}]  }
   0x1   :  { %v418_v0 = vld [vmem:[%s495_s3] sm:$0xff]  ;;  %315 = vset.pattern.permute.xlu0 %v358_v2  ;;  %312 = vset.pattern.permute.xlu1 %v359_v3 }
   0x2   :  { %v27_v1 = vld [vmem:[%s493_s1] sm:$0xff]  ;;  %109 = vperm.xlu0 %315, %v418_v0  }
   0x3   :  { %65 = vperm.xlu1 %312, %v27_v1  }
   0x4   :  { %12 = vsyncpa [#allocation3], 0  ;;  %v360_v4 = vmov 0   ;;  %v29_v5 = vld [vmem:[%s494_s2] sm:$0xff]  ;;  %v28_v7 = vld [vmem:[%s493_s1 + $0x8] sm:$0xff]  ;;  %v361_v9 = vmov 3   ;;  %v56_v24 = vlaneseq }
   0x5   :  { %v32_v6 = vld [vmem:[%s496_s4] sm:$0xff]  ;;  %v30_v8 = vld [vmem:[%s494_s2 + $0x8] sm:$0xff]  ;;  %v362_v10 = vmov 5   ;;  %v363_v11 = vmov 8   ;;  %v364_v12 = vmov 4   ;;  %v365_v13 = vmov 11  }
   0x6   :  { %316 = vset.pattern.permute.xlu0 %v360_v4  ;;  %v366_v14 = vmov 6   ;;  %v367_v15 = vmov 14   ;;  %v368_v16 = vmov 7   ;;  %v33_v17 = vld [vmem:[%s497_s5] sm:$0xff]  ;;  %v369_v18 = vmov 9  }
   0x7   :  { %313 = vset.pattern.permute.xlu1 %v360_v4  ;;  %48 = vperm.xlu0 %316, %v27_v1   ;;  %v370_v19 = vmov 10   ;;  %v371_v20 = vmov 12   ;;  %v372_v21 = vmov 13   ;;  %v373_v22 = vmov 15   ;;  %v34_v23 = vld [vmem:[%s498_s6] sm:$0x3] }
   0x8   :  { %89 = vperm.xlu1 %313, %v418_v0   ;;  %v457_v25 = vshrl.u32 %v56_v24, 7  ;;  %v35_v29 = vld [vmem:[%s492_s0] sm:$0x3]  ;;  %s374_s0 = smov [#allocation2]  }
   0x9   :  { %s287_s6 = sshll.u32 %s374_s0, 4  ;;  %s288_s6 = int_to_ptr.vmem [resolvable:$true] %s287_s6 }
   0xa   :  { %v460_v26 = vsub.s32 0, %v457_v25  ;;  %v466_v30 = vsub.s32 1, %v457_v25  ;;  %v114_v45 = vsub.s32 2, %v457_v25  ;;  %v124_v53 = vsub.s32 3, %v457_v25  ;;  %s334_s14 = scalar_lea.vmem %s288_s6, 32  ;;  %p339_p1 = scmp.lt.s32.totalorder %s288_s6, %s288_s6 }
   0xb   :  { %38 = vperm.xlu0 %316, %v29_v5   ;;  %v134_v56 = vsub.s32 4, %v457_v25  ;;  %v144_v62 = vsub.s32 5, %v457_v25  ;;  %v154_v5 = vsub.s32 6, %v457_v25  ;;  %p335_p0 = scmp.ne.s32.totalorder %s288_s6, %s334_s14  ;;  %p340_p2 = scmp.lt.s32.totalorder %s334_s14, %s334_s14 }
   0xc   :  { %314 = vset.pattern.permute.xlu1 %v359_v3  ;;  %v59_v31 = vrot.slane %v35_v29, %v460_v26  ;;  %v75_v34 = vrot.slane %v35_v29, %v466_v30 }
   0xd   :  { %99 = vperm.xlu1 %314, %v418_v0   ;;  %p341_p3 = por %p340_p2, %p339_p1 }
   0xf   :  { %84 = vperm.xlu0 %316, %v32_v6   ;;  %p342_p4 = pnand %p341_p3, %p335_p0 }
  0x11   :  { %317 = vset.pattern.permute.xlu1 %v360_v4 }
  0x12   :  { %53 = vperm.xlu1 %317, %v28_v7  }
  0x13   :  { %43 = vperm.xlu0 %316, %v30_v8  }
  0x16   :  { %318 = vset.pattern.permute.xlu1 %v361_v9 }
  0x17   :  { %119 = vperm.xlu1 %318, %v418_v0   ;;  %321 = vset.pattern.permute.xlu0 %v362_v10 }
  0x18   :  { %139 = vperm.xlu0 %321, %v418_v0  }
  0x1b   :  { %319 = vset.pattern.permute.xlu1 %v359_v3 }
  0x1c   :  { %69 = vperm.xlu1 %319, %v28_v7   ;;  %324 = vset.pattern.permute.xlu0 %v363_v11 }
  0x1d   :  { %169 = vperm.xlu0 %324, %v418_v0  }
  0x20   :  { %320 = vset.pattern.permute.xlu1 %v364_v12 }
  0x21   :  { %129 = vperm.xlu1 %320, %v418_v0   ;;  %327 = vset.pattern.permute.xlu0 %v365_v13  ;;  %v164_v13 = vsub.s32 7, %v457_v25 }
  0x22   :  { %199 = vperm.xlu0 %327, %v418_v0  }
  0x25   :  { %322 = vset.pattern.permute.xlu1 %v366_v14 }
  0x26   :  { %149 = vperm.xlu1 %322, %v418_v0   ;;  %330 = vset.pattern.permute.xlu0 %v367_v15 }
  0x27   :  { %229 = vperm.xlu0 %330, %v418_v0  }
  0x2a   :  { %323 = vset.pattern.permute.xlu1 %v368_v16 }
  0x2b   :  { %159 = vperm.xlu1 %323, %v418_v0   ;;  %333 = vset.pattern.permute.xlu0 %v359_v3 }
  0x2c   :  { %269 = vperm.xlu0 %333, %v33_v17  }
  0x2f   :  { %325 = vset.pattern.permute.xlu1 %v369_v18 }
  0x30   :  { %179 = vperm.xlu1 %325, %v418_v0  }
  0x34   :  { %326 = vset.pattern.permute.xlu1 %v370_v19 }
  0x35   :  { %189 = vperm.xlu1 %326, %v418_v0  }
  0x39   :  { %328 = vset.pattern.permute.xlu1 %v371_v20 }
  0x3a   :  { %209 = vperm.xlu1 %328, %v418_v0  }
  0x3e   :  { %329 = vset.pattern.permute.xlu1 %v372_v21 }
  0x3f   :  { %219 = vperm.xlu1 %329, %v418_v0  }
  0x43   :  { %331 = vset.pattern.permute.xlu1 %v373_v22 }
  0x44   :  { %239 = vperm.xlu1 %331, %v418_v0  }
  0x48   :  { %332 = vset.pattern.permute.xlu1 %v360_v4 }
  0x49   :  { %251 = vperm.xlu1 %332, %v33_v17  }
  0x4d   :  { %263 = vperm.xlu1 %332, %v34_v23  }
  0x81   :  { %v110_v28 = vpop.permute.xlu0 %109 }
  0x82   :  { %v66_v27 = vpop.permute.xlu1 %65 }
  0x83   :  { %v76_v37 = vmul.f32 %v75_v34, %v66_v27 }
  0x86   :  { %v49_v32 = vpop.permute.xlu0 %48 }
  0x87   :  { %v90_v33 = vpop.permute.xlu1 %89  ;;  %v60_v35 = vmul.f32 %v59_v31, %v49_v32 }
  0x8a   :  { %v39_v36 = vpop.permute.xlu0 %38 }
  0x8b   :  { %v62_v38 = vadd.f32 %v60_v35, %v39_v36 }
  0x8c   :  { %v100_v39 = vpop.permute.xlu1 %99 }
  0x8d   :  { %v78_v40 = vadd.f32 %v76_v37, %v62_v38 }
  0x8e   :  { %v85_v47 = vpop.permute.xlu0 %84 }
  0x8f   :  { %v80_v41 = vmax.f32 %v78_v40, 0.0 }
  0x91   :  { %v54_v42 = vpop.permute.xlu1 %53  ;;  %v95_v43 = vrot.slane %v80_v41, %v460_v26  ;;  %v105_v44 = vrot.slane %v80_v41, %v466_v30  ;;  %v115_v51 = vrot.slane %v80_v41, %v114_v45  ;;  %v125_v60 = vrot.slane %v80_v41, %v124_v53 }
  0x92   :  { %v44_v57 = vpop.permute.xlu0 %43  ;;  %v61_v58 = vmul.f32 %v59_v31, %v54_v42  ;;  %v135_v0 = vrot.slane %v80_v41, %v134_v56  ;;  %v145_v7 = vrot.slane %v80_v41, %v144_v62  ;;  %v155_v11 = vrot.slane %v80_v41, %v154_v5 }
  0x93   :  { %v96_v46 = vmul.f32 %v95_v43, %v90_v33  ;;  %v106_v50 = vmul.f32 %v105_v44, %v100_v39  ;;  %v116_v54 = vmul.f32 %v115_v51, %v110_v28  ;;  %v165_v17 = vrot.slane %v80_v41, %v164_v13 }
  0x94   :  { %v63_v2 = vadd.f32 %v61_v58, %v44_v57 }
  0x95   :  { %v97_v48 = vadd.f32 %v96_v46, %v85_v47 }
  0x96   :  { %v120_v49 = vpop.permute.xlu1 %119 }
  0x97   :  { %v107_v52 = vadd.f32 %v106_v50, %v97_v48  ;;  %v126_v61 = vmul.f32 %v125_v60, %v120_v49  ;;  %v140_v6 = vpop.permute.xlu0 %139 }
  0x98   :  { %v146_v10 = vmul.f32 %v145_v7, %v140_v6 }
  0x99   :  { %v117_v59 = vadd.f32 %v116_v54, %v107_v52 }
  0x9b   :  { %v70_v55 = vpop.permute.xlu1 %69  ;;  %v127_v3 = vadd.f32 %v126_v61, %v117_v59 }
  0x9c   :  { %v77_v63 = vmul.f32 %v75_v34, %v70_v55  ;;  %v170_v23 = vpop.permute.xlu0 %169 }
  0x9e   :  { %v79_v8 = vadd.f32 %v77_v63, %v63_v2 }
  0xa0   :  { %v130_v1 = vpop.permute.xlu1 %129  ;;  %v81_v14 = vmax.f32 %v79_v8, 0.0 }
  0xa1   :  { %v136_v4 = vmul.f32 %v135_v0, %v130_v1  ;;  %v200_v36 = vpop.permute.xlu0 %199 }
  0xa2   :  { %v175_v19 = vrot.slane %v81_v14, %v460_v26  ;;  %v185_v27 = vrot.slane %v81_v14, %v466_v30  ;;  %v195_v32 = vrot.slane %v81_v14, %v114_v45  ;;  %v205_v25 = vrot.slane %v81_v14, %v124_v53 }
  0xa3   :  { %v137_v9 = vadd.f32 %v136_v4, %v127_v3  ;;  %v215_v39 = vrot.slane %v81_v14, %v134_v56  ;;  %v225_v42 = vrot.slane %v81_v14, %v144_v62  ;;  %v235_v46 = vrot.slane %v81_v14, %v154_v5 }
  0xa4   :  { %v176_v24 = vmul.f32 %v175_v19, %v170_v23  ;;  %v206_v38 = vmul.f32 %v205_v25, %v200_v36  ;;  %v245_v45 = vrot.slane %v81_v14, %v164_v13 }
  0xa5   :  { %v150_v12 = vpop.permute.xlu1 %149  ;;  %v147_v15 = vadd.f32 %v146_v10, %v137_v9 }
  0xa6   :  { %v156_v16 = vmul.f32 %v155_v11, %v150_v12  ;;  %v230_v43 = vpop.permute.xlu0 %229 }
  0xa7   :  { %v236_v48 = vmul.f32 %v235_v46, %v230_v43 }
  0xa8   :  { %v157_v20 = vadd.f32 %v156_v16, %v147_v15 }
  0xaa   :  { %v160_v18 = vpop.permute.xlu1 %159 }
  0xab   :  { %v166_v21 = vmul.f32 %v165_v17, %v160_v18  ;;  %v270_v54 = vpop.permute.xlu0 %269 }
  0xad   :  { %v167_v22 = vadd.f32 %v166_v21, %v157_v20 }
  0xaf   :  { %v180_v28 = vpop.permute.xlu1 %179  ;;  %v177_v29 = vadd.f32 %v176_v24, %v167_v22 }
  0xb0   :  { %v186_v31 = vmul.f32 %v185_v27, %v180_v28 }
  0xb2   :  { %v187_v34 = vadd.f32 %v186_v31, %v177_v29 }
  0xb4   :  { %v190_v33 = vpop.permute.xlu1 %189 }
  0xb5   :  { %v196_v35 = vmul.f32 %v195_v32, %v190_v33 }
  0xb7   :  { %v197_v37 = vadd.f32 %v196_v35, %v187_v34 }
  0xb9   :  { %v210_v26 = vpop.permute.xlu1 %209  ;;  %v207_v40 = vadd.f32 %v206_v38, %v197_v37 }
  0xba   :  { %v216_v41 = vmul.f32 %v215_v39, %v210_v26 }
  0xbc   :  { %v217_v30 = vadd.f32 %v216_v41, %v207_v40 }
  0xbe   :  { %v220_v44 = vpop.permute.xlu1 %219 }
  0xbf   :  { %v226_v47 = vmul.f32 %v225_v42, %v220_v44 }
  0xc1   :  { %v227_v49 = vadd.f32 %v226_v47, %v217_v30 }
  0xc3   :  { %v237_v50 = vadd.f32 %v236_v48, %v227_v49  ;;  %v240_v51 = vpop.permute.xlu1 %239 }
  0xc4   :  { %v246_v52 = vmul.f32 %v245_v45, %v240_v51 }
  0xc6   :  { %v247_v53 = vadd.f32 %v246_v52, %v237_v50 }
  0xc8   :  { %v248_v55 = vmax.f32 %v247_v53, 0.0  ;;  %v252_v57 = vpop.permute.xlu1 %251 }
  0xca   :  { %v254_v56 = vmul.f32 %v252_v57, %v248_v55  ;;  %v272_v58 = vmul.f32 %v270_v54, %v248_v55 }
  0xcc   :  { %v255_v59 = vrot.slane %v254_v56, 4  ;;  %v273_v60 = vrot.slane %v272_v58, 4  ;;  %v264_v7 = vpop.permute.xlu1 %263 }
  0xce   :  { %v256_v61 = vadd.f32 %v255_v59, %v254_v56  ;;  %v274_v62 = vadd.f32 %v273_v60, %v272_v58 }
  0xd0   :  { %v257_v63 = vrot.slane %v256_v61, 2  ;;  %v275_v0 = vrot.slane %v274_v62, 2 }
  0xd2   :  { %v258_v1 = vadd.f32 %v257_v63, %v256_v61  ;;  %v276_v2 = vadd.f32 %v275_v0, %v274_v62 }
  0xd4   :  { %v259_v3 = vrot.slane %v258_v1, 1  ;;  %v277_v4 = vrot.slane %v276_v2, 1 }
  0xd6   :  { %v260_v5 = vadd.f32 %v259_v3, %v258_v1  ;;  %v278_v6 = vadd.f32 %v277_v4, %v276_v2 }
  0xd8   :  { %v266_v8 = vadd.f32 %v264_v7, %v260_v5  ;;  %v279_v9 = vadd.f32 %v278_v6, %v264_v7 }
  0xda   :  { %267 = vst [vmem:[#allocation2] sm:$0x1] %v266_v8  ;;  %280 = vst [vmem:[#allocation2] sm:$0x2] %v279_v9 }
  0xdb   :  { %345 = shalt.err (!%p342_p4)
}
  0xdc   :  { %s346_s17 = scalar_lea.hbm %s499_s7, 32 }
  0xdd   :  { %p347_p5 = scmp.ne.s32.totalorder %s499_s7, %s346_s17  ;;  %p350_p6 = scmp.lt.u32.totalorder %s346_s17, %s499_s7 }
  0xdf   :  { %p352_p7 = pnand %p350_p6, %p347_p5 }
  0xe1   :  { %355 = shalt.err (!%p352_p7)
}
  0xe2   :  { %290 = dma.vmem_to_hbm [thread:$0]  %s288_s6, 32, %s499_s7, [#allocation3]  }
  0xe3   :  { %356 = dma.done.wait [#allocation3], 32  }
  0xe4   :  { %357 = vsyncadd [#allocation3], 4294967264 }
  0xe5   :  { %294 = vsyncpa [#allocation3], 1 }

</bundles_post_ra>
